<compile_context>
chip_gen: v6e
topology: v6e:2x2x1
jax: 0.10.0
libtpu: 0.0.40
codegen_flags: <defaults>
</compile_context>

<pallas_src>
import functools

import jax
import jax.numpy as jnp
from jax.experimental import pallas as pl
from jax.experimental.pallas import tpu as pltpu


def _block_diag(w):
    """(H, Dh, Dh) per-head weights -> (E, E) block-diagonal matrix so that
    (x @ W_bd)[:, h*Dh:(h+1)*Dh] == x[:, h*Dh:(h+1)*Dh] @ w[h]."""
    H, Dh, _ = w.shape
    eye = jnp.eye(H, dtype=w.dtype)
    return jnp.einsum('hij,hg->higj', w, eye).reshape(H * Dh, H * Dh)


def _mhsa_kernel(x_ref, wq_ref, wk_ref, wv_ref, wmt_ref, bm_ref, o_ref,
                 *, n_heads, dim_head):
    # x_ref block: (1, S, E).  Weights are full-resident (constant index maps).
    x = x_ref[0]                                  # (S, E), compute dtype
    cd = x.dtype                                  # bf16 or f32 MXU operand dtype
    S, E = x.shape
    scale = 1.0 / (dim_head ** 0.5)

    # Fused full-width projections (block-diagonal weights), f32 accumulation.
    q = jnp.dot(x, wq_ref[...], preferred_element_type=jnp.float32)   # (S, E)
    k = jnp.dot(x, wk_ref[...], preferred_element_type=jnp.float32)
    v = jnp.dot(x, wv_ref[...], preferred_element_type=jnp.float32)

    # Per-head attention; head concat is fused into the output projection by
    # accumulating head_out @ W_mlp^T[h*Dh:(h+1)*Dh, :] into one accumulator.
    acc = jnp.zeros((S, E), jnp.float32)
    for h in range(n_heads):                      # tiny static loop
        lo = h * dim_head
        hi = lo + dim_head
        qh = q[:, lo:hi].astype(cd)               # (S, Dh)
        kh = k[:, lo:hi].astype(cd)
        vh = v[:, lo:hi].astype(cd)

        # scores = q @ k^T without materializing a transpose.
        s = jax.lax.dot_general(
            qh, kh, dimension_numbers=(((1,), (1,)), ((), ())),
            preferred_element_type=jnp.float32) * scale          # (S, S) f32

        # Numerically-safe softmax, all in f32; reciprocal on the EUP.
        s = s - jnp.max(s, axis=-1, keepdims=True)
        p = jnp.exp(s)
        p = p * pl.reciprocal(jnp.sum(p, axis=-1, keepdims=True), approx=True)

        pv = jnp.dot(p.astype(cd), vh, preferred_element_type=jnp.float32)  # (S, Dh)

        # Sublane slice of the pre-transposed W_mlp (Dh is a multiple of 8).
        wm_h = wmt_ref[lo:hi, :]                  # (Dh, E)
        acc = acc + jnp.dot(pv.astype(cd), wm_h,
                            preferred_element_type=jnp.float32)   # (S, E)

    out = acc + bm_ref[...].astype(jnp.float32)   # (S, E) + (1, E)
    o_ref[0] = out.astype(o_ref.dtype)


def multi_headed_self_attention(sequences, w_q, w_k, w_v, w_mlp, b_mlp,
                                *, n_heads, dim_head,
                                matmul_dtype=jnp.bfloat16):
    """sequences: (B, S, E); w_q/w_k/w_v: (H, Dh, Dh); w_mlp: (E, E); b_mlp: (E,).

    matmul_dtype: dtype of MXU operands (bf16 recommended on v6e/v7x; pass
    jnp.float32 for full-precision / v5e-style behaviour).  Accumulation and
    softmax math are always f32.
    """
    B, S, E = sequences.shape
    assert E == n_heads * dim_head

    # One-time wrapper-side prep (negligible relative to the kernel).
    wq_bd = _block_diag(w_q).astype(matmul_dtype)            # (E, E)
    wk_bd = _block_diag(w_k).astype(matmul_dtype)
    wv_bd = _block_diag(w_v).astype(matmul_dtype)
    wm_t = w_mlp.T.astype(matmul_dtype)                      # pre-transposed once
    b2d = b_mlp.reshape(1, E).astype(jnp.float32)
    x = sequences.astype(matmul_dtype)

    kernel = functools.partial(_mhsa_kernel, n_heads=n_heads, dim_head=dim_head)

    return pl.pallas_call(
        kernel,
        out_shape=jax.ShapeDtypeStruct((B, S, E), sequences.dtype),
        grid_spec=pltpu.PrefetchScalarGridSpec(
            num_scalar_prefetch=0,
            grid=(B,),
            in_specs=[
                pl.BlockSpec((1, S, E), lambda b: (b, 0, 0)),   # x
                pl.BlockSpec((E, E), lambda b: (0, 0)),         # W_q block-diag
                pl.BlockSpec((E, E), lambda b: (0, 0)),         # W_k block-diag
                pl.BlockSpec((E, E), lambda b: (0, 0)),         # W_v block-diag
                pl.BlockSpec((E, E), lambda b: (0, 0)),         # W_mlp^T
                pl.BlockSpec((1, E), lambda b: (0, 0)),         # b_mlp
            ],
            out_specs=pl.BlockSpec((1, S, E), lambda b: (b, 0, 0)),
        ),
        compiler_params=pltpu.CompilerParams(
            dimension_semantics=("parallel",)),
    )(x, wq_bd, wk_bd, wv_bd, wm_t, b2d)


def _reference(sequences, w_q, w_k, w_v, w_mlp, b_mlp, *, n_heads, dim_head):
    """Pure-JAX transcription of the PyTorch forward, for validation."""
    B, S, E = sequences.shape
    x = sequences.reshape(B * S, n_heads, dim_head)
    q = jnp.einsum('bnd,ndh->bnh', x, w_q).reshape(B, S, n_heads, dim_head)
    k = jnp.einsum('bnd,ndh->bnh', x, w_k).reshape(B, S, n_heads, dim_head)
    v = jnp.einsum('bnd,ndh->bnh', x, w_v).reshape(B, S, n_heads, dim_head)
    q, k, v = (t.transpose(0, 2, 1, 3) for t in (q, k, v))        # (B, H, S, Dh)
    scores = jnp.einsum('bhqd,bhkd->bhqk', q, k) / (dim_head ** 0.5)
    weights = jax.nn.softmax(scores, axis=-1)
    attn = jnp.einsum('bhqk,bhkd->bhqd', weights, v)
    attn = attn.transpose(0, 2, 1, 3).reshape(B, S, E)
    return attn @ w_mlp.T + b_mlp


if __name__ == "__main__":
    B, S = 2, 8
    n_heads, dim_head = 2, 16
    E = n_heads * dim_head  # dim_embedding = 32

    key = jax.random.PRNGKey(0)
    kx, kq, kk, kv, km, kb = jax.random.split(key, 6)

    sequences = jax.random.normal(kx, (B, S, E), dtype=jnp.float32)
    # Deterministic synthetic parameters (same shapes as the nn.Module's params).
    w_q = jax.random.normal(kq, (n_heads, dim_head, dim_head), jnp.float32) * 0.1
    w_k = jax.random.normal(kk, (n_heads, dim_head, dim_head), jnp.float32) * 0.1
    w_v = jax.random.normal(kv, (n_heads, dim_head, dim_head), jnp.float32) * 0.1
    w_mlp = jax.random.normal(km, (E, E), jnp.float32) * 0.1
    b_mlp = jax.random.normal(kb, (E,), jnp.float32) * 0.1

    ref = _reference(sequences, w_q, w_k, w_v, w_mlp, b_mlp,
                     n_heads=n_heads, dim_head=dim_head)

    # Full-precision MXU operands: tight check.
    out_f32 = multi_headed_self_attention(
        sequences, w_q, w_k, w_v, w_mlp, b_mlp,
        n_heads=n_heads, dim_head=dim_head, matmul_dtype=jnp.float32)
    out_f32 = jax.block_until_ready(out_f32)
    assert out_f32.shape == (B, S, E)
    assert jnp.allclose(out_f32, ref, atol=5e-3, rtol=5e-3)

    # Default bf16 MXU operands (f32 accumulation / f32 softmax): loose check.
    out_bf16 = multi_headed_self_attention(
        sequences, w_q, w_k, w_v, w_mlp, b_mlp,
        n_heads=n_heads, dim_head=dim_head)
    out_bf16 = jax.block_until_ready(out_bf16)
    assert out_bf16.shape == (B, S, E)
    assert jnp.allclose(out_bf16, ref, atol=5e-2, rtol=5e-2)

    print("KERNEL_OK")
</pallas_src>

<mosaic_0001>
module attributes {stable_mosaic.version = 11 : i64} {
  func.func @_mhsa_kernel(%arg0: i32, %arg1: memref<1x8x32xf32, #tpu.memory_space<vmem>>, %arg2: memref<32x32xf32, #tpu.memory_space<vmem>>, %arg3: memref<32x32xf32, #tpu.memory_space<vmem>>, %arg4: memref<32x32xf32, #tpu.memory_space<vmem>>, %arg5: memref<32x32xf32, #tpu.memory_space<vmem>>, %arg6: memref<1x32xf32, #tpu.memory_space<vmem>>, %arg7: memref<1x8x32xf32, #tpu.memory_space<vmem>>) attributes {dimension_semantics = [#tpu.dimension_semantics<parallel>], iteration_bounds = array<i64: 2>, scalar_prefetch = 0 : i64, scratch_operands = 0 : i64, tpu.core_type = #tpu.core_type<tc>, window_params = [{transform_indices = @transform_0, window_bounds = array<i64: 1, 8, 32>}, {pipeline_mode = #tpu.pipeline_mode<synchronous>, transform_indices = @transform_1, window_bounds = array<i64: 32, 32>}, {pipeline_mode = #tpu.pipeline_mode<synchronous>, transform_indices = @transform_2, window_bounds = array<i64: 32, 32>}, {pipeline_mode = #tpu.pipeline_mode<synchronous>, transform_indices = @transform_3, window_bounds = array<i64: 32, 32>}, {pipeline_mode = #tpu.pipeline_mode<synchronous>, transform_indices = @transform_4, window_bounds = array<i64: 32, 32>}, {pipeline_mode = #tpu.pipeline_mode<synchronous>, transform_indices = @transform_5, window_bounds = array<i64: 1, 32>}, {transform_indices = @transform_6, window_bounds = array<i64: 1, 8, 32>}]} {
    %c0 = arith.constant 0 : index
    %c0_0 = arith.constant 0 : index
    %c0_1 = arith.constant 0 : index
    %0 = vector.load %arg1[%c0, %c0_0, %c0_1] : memref<1x8x32xf32, #tpu.memory_space<vmem>>, vector<1x8x32xf32>
    %1 = vector.shape_cast %0 : vector<1x8x32xf32> to vector<8x32xf32>
    %c0_2 = arith.constant 0 : index
    %c0_3 = arith.constant 0 : index
    %2 = vector.load %arg2[%c0_2, %c0_3] : memref<32x32xf32, #tpu.memory_space<vmem>>, vector<32x32xf32>
    %cst = arith.constant dense<0.000000e+00> : vector<8x32xf32>
    %3 = tpu.matmul %1, %2, %cst {dimension_numbers = #tpu.dot_dimension_numbers<[1], [0], [0], [1], [0, 0, 1, 1], [], []>} : vector<8x32xf32>, vector<32x32xf32>, vector<8x32xf32> -> vector<8x32xf32>
    %c0_4 = arith.constant 0 : index
    %c0_5 = arith.constant 0 : index
    %4 = vector.load %arg3[%c0_4, %c0_5] : memref<32x32xf32, #tpu.memory_space<vmem>>, vector<32x32xf32>
    %cst_6 = arith.constant dense<0.000000e+00> : vector<8x32xf32>
    %5 = tpu.matmul %1, %4, %cst_6 {dimension_numbers = #tpu.dot_dimension_numbers<[1], [0], [0], [1], [0, 0, 1, 1], [], []>} : vector<8x32xf32>, vector<32x32xf32>, vector<8x32xf32> -> vector<8x32xf32>
    %c0_7 = arith.constant 0 : index
    %c0_8 = arith.constant 0 : index
    %6 = vector.load %arg4[%c0_7, %c0_8] : memref<32x32xf32, #tpu.memory_space<vmem>>, vector<32x32xf32>
    %cst_9 = arith.constant dense<0.000000e+00> : vector<8x32xf32>
    %7 = tpu.matmul %1, %6, %cst_9 {dimension_numbers = #tpu.dot_dimension_numbers<[1], [0], [0], [1], [0, 0, 1, 1], [], []>} : vector<8x32xf32>, vector<32x32xf32>, vector<8x32xf32> -> vector<8x32xf32>
    %cst_10 = arith.constant 0.000000e+00 : f32
    %8 = vector.broadcast %cst_10 : f32 to vector<8x32xf32>
    %9 = vector.extract_strided_slice %3 {offsets = [0, 0], sizes = [8, 16], strides = [1, 1]} : vector<8x32xf32> to vector<8x16xf32>
    %10 = vector.extract_strided_slice %5 {offsets = [0, 0], sizes = [8, 16], strides = [1, 1]} : vector<8x32xf32> to vector<8x16xf32>
    %11 = vector.extract_strided_slice %7 {offsets = [0, 0], sizes = [8, 16], strides = [1, 1]} : vector<8x32xf32> to vector<8x16xf32>
    %cst_11 = arith.constant dense<0.000000e+00> : vector<8x8xf32>
    %12 = tpu.matmul %9, %10, %cst_11 {dimension_numbers = #tpu.dot_dimension_numbers<[1], [1], [0], [0], [0, 0, 1, 0], [], []>} : vector<8x16xf32>, vector<8x16xf32>, vector<8x8xf32> -> vector<8x8xf32>
    %cst_12 = arith.constant 2.500000e-01 : f32
    %13 = vector.broadcast %cst_12 : f32 to vector<8x8xf32>
    %14 = arith.mulf %12, %13 : vector<8x8xf32>
    %cst_13 = arith.constant dense<0xFF800000> : vector<8xf32>
    %15 = vector.multi_reduction <maximumf>, %14, %cst_13 [1] : vector<8x8xf32> to vector<8xf32>
    %16 = vector.shape_cast %15 : vector<8xf32> to vector<8x1xf32>
    %17 = vector.broadcast %16 : vector<8x1xf32> to vector<8x8xf32>
    %18 = arith.subf %14, %17 : vector<8x8xf32>
    %19 = math.exp %18 : vector<8x8xf32>
    %cst_14 = arith.constant dense<0.000000e+00> : vector<8xf32>
    %20 = vector.multi_reduction <add>, %19, %cst_14 [1] : vector<8x8xf32> to vector<8xf32>
    %21 = vector.shape_cast %20 : vector<8xf32> to vector<8x1xf32>
    %22 = tpu.reciprocal %21 {approx = true} : vector<8x1xf32> -> vector<8x1xf32>
    %23 = vector.broadcast %22 : vector<8x1xf32> to vector<8x8xf32>
    %24 = arith.mulf %19, %23 : vector<8x8xf32>
    %cst_15 = arith.constant dense<0.000000e+00> : vector<8x16xf32>
    %25 = tpu.matmul %24, %11, %cst_15 {dimension_numbers = #tpu.dot_dimension_numbers<[1], [0], [0], [1], [0, 0, 1, 1], [], []>} : vector<8x8xf32>, vector<8x16xf32>, vector<8x16xf32> -> vector<8x16xf32>
    %c0_16 = arith.constant 0 : index
    %c0_17 = arith.constant 0 : index
    %26 = vector.load %arg5[%c0_16, %c0_17] : memref<32x32xf32, #tpu.memory_space<vmem>>, vector<16x32xf32>
    %cst_18 = arith.constant dense<0.000000e+00> : vector<8x32xf32>
    %27 = tpu.matmul %25, %26, %cst_18 {dimension_numbers = #tpu.dot_dimension_numbers<[1], [0], [0], [1], [0, 0, 1, 1], [], []>} : vector<8x16xf32>, vector<16x32xf32>, vector<8x32xf32> -> vector<8x32xf32>
    %28 = arith.addf %8, %27 : vector<8x32xf32>
    %29 = vector.extract_strided_slice %3 {offsets = [0, 16], sizes = [8, 16], strides = [1, 1]} : vector<8x32xf32> to vector<8x16xf32>
    %30 = vector.extract_strided_slice %5 {offsets = [0, 16], sizes = [8, 16], strides = [1, 1]} : vector<8x32xf32> to vector<8x16xf32>
    %31 = vector.extract_strided_slice %7 {offsets = [0, 16], sizes = [8, 16], strides = [1, 1]} : vector<8x32xf32> to vector<8x16xf32>
    %cst_19 = arith.constant dense<0.000000e+00> : vector<8x8xf32>
    %32 = tpu.matmul %29, %30, %cst_19 {dimension_numbers = #tpu.dot_dimension_numbers<[1], [1], [0], [0], [0, 0, 1, 0], [], []>} : vector<8x16xf32>, vector<8x16xf32>, vector<8x8xf32> -> vector<8x8xf32>
    %cst_20 = arith.constant 2.500000e-01 : f32
    %33 = vector.broadcast %cst_20 : f32 to vector<8x8xf32>
    %34 = arith.mulf %32, %33 : vector<8x8xf32>
    %cst_21 = arith.constant dense<0xFF800000> : vector<8xf32>
    %35 = vector.multi_reduction <maximumf>, %34, %cst_21 [1] : vector<8x8xf32> to vector<8xf32>
    %36 = vector.shape_cast %35 : vector<8xf32> to vector<8x1xf32>
    %37 = vector.broadcast %36 : vector<8x1xf32> to vector<8x8xf32>
    %38 = arith.subf %34, %37 : vector<8x8xf32>
    %39 = math.exp %38 : vector<8x8xf32>
    %cst_22 = arith.constant dense<0.000000e+00> : vector<8xf32>
    %40 = vector.multi_reduction <add>, %39, %cst_22 [1] : vector<8x8xf32> to vector<8xf32>
    %41 = vector.shape_cast %40 : vector<8xf32> to vector<8x1xf32>
    %42 = tpu.reciprocal %41 {approx = true} : vector<8x1xf32> -> vector<8x1xf32>
    %43 = vector.broadcast %42 : vector<8x1xf32> to vector<8x8xf32>
    %44 = arith.mulf %39, %43 : vector<8x8xf32>
    %cst_23 = arith.constant dense<0.000000e+00> : vector<8x16xf32>
    %45 = tpu.matmul %44, %31, %cst_23 {dimension_numbers = #tpu.dot_dimension_numbers<[1], [0], [0], [1], [0, 0, 1, 1], [], []>} : vector<8x8xf32>, vector<8x16xf32>, vector<8x16xf32> -> vector<8x16xf32>
    %c16 = arith.constant 16 : index
    %c0_24 = arith.constant 0 : index
    %46 = vector.load %arg5[%c16, %c0_24] : memref<32x32xf32, #tpu.memory_space<vmem>>, vector<16x32xf32>
    %cst_25 = arith.constant dense<0.000000e+00> : vector<8x32xf32>
    %47 = tpu.matmul %45, %46, %cst_25 {dimension_numbers = #tpu.dot_dimension_numbers<[1], [0], [0], [1], [0, 0, 1, 1], [], []>} : vector<8x16xf32>, vector<16x32xf32>, vector<8x32xf32> -> vector<8x32xf32>
    %48 = arith.addf %28, %47 : vector<8x32xf32>
    %c0_26 = arith.constant 0 : index
    %c0_27 = arith.constant 0 : index
    %49 = vector.load %arg6[%c0_26, %c0_27] : memref<1x32xf32, #tpu.memory_space<vmem>>, vector<1x32xf32>
    %50 = vector.broadcast %49 : vector<1x32xf32> to vector<8x32xf32>
    %51 = arith.addf %48, %50 : vector<8x32xf32>
    %c0_28 = arith.constant 0 : index
    %c0_29 = arith.constant 0 : index
    %c0_30 = arith.constant 0 : index
    %52 = vector.load %arg7[%c0_28, %c0_29, %c0_30] : memref<1x8x32xf32, #tpu.memory_space<vmem>>, vector<1x8x32xf32>
    %53 = vector.shape_cast %52 : vector<1x8x32xf32> to vector<8x32xf32>
    %54 = vector.shape_cast %51 : vector<8x32xf32> to vector<1x8x32xf32>
    tpu.vector_store %arg7[%c0_28, %c0_29, %c0_30], %54 {strides = array<i32>} : memref<1x8x32xf32, #tpu.memory_space<vmem>>, vector<1x8x32xf32>,
    return
  }
  func.func @transform_0(%arg0: i32) -> (i32, i32, i32) {
    %c0_i32 = arith.constant 0 : i32
    %c0_i32_0 = arith.constant 0 : i32
    %c0_i32_1 = arith.constant 0 : i32
    return %arg0, %c0_i32, %c0_i32_0 : i32, i32, i32
  }
  func.func @transform_1(%arg0: i32) -> (i32, i32) {
    %c0_i32 = arith.constant 0 : i32
    %c0_i32_0 = arith.constant 0 : i32
    %c0_i32_1 = arith.constant 0 : i32
    return %c0_i32, %c0_i32_0 : i32, i32
  }
  func.func @transform_2(%arg0: i32) -> (i32, i32) {
    %c0_i32 = arith.constant 0 : i32
    %c0_i32_0 = arith.constant 0 : i32
    %c0_i32_1 = arith.constant 0 : i32
    return %c0_i32, %c0_i32_0 : i32, i32
  }
  func.func @transform_3(%arg0: i32) -> (i32, i32) {
    %c0_i32 = arith.constant 0 : i32
    %c0_i32_0 = arith.constant 0 : i32
    %c0_i32_1 = arith.constant 0 : i32
    return %c0_i32, %c0_i32_0 : i32, i32
  }
  func.func @transform_4(%arg0: i32) -> (i32, i32) {
    %c0_i32 = arith.constant 0 : i32
    %c0_i32_0 = arith.constant 0 : i32
    %c0_i32_1 = arith.constant 0 : i32
    return %c0_i32, %c0_i32_0 : i32, i32
  }
  func.func @transform_5(%arg0: i32) -> (i32, i32) {
    %c0_i32 = arith.constant 0 : i32
    %c0_i32_0 = arith.constant 0 : i32
    %c0_i32_1 = arith.constant 0 : i32
    return %c0_i32, %c0_i32_0 : i32, i32
  }
  func.func @transform_6(%arg0: i32) -> (i32, i32, i32) {
    %c0_i32 = arith.constant 0 : i32
    %c0_i32_0 = arith.constant 0 : i32
    %c0_i32_1 = arith.constant 0 : i32
    return %arg0, %c0_i32, %c0_i32_0 : i32, i32, i32
  }
}

</mosaic_0001>

<bundles_post_ra>
// kernel: tpu_custom_call.1
= control target key start
LH: loop header
LB: loop body
LE: loop exit
PB: predicated region body
PF: predicated region fallthrough
CT: control target
= control target key end

     0   :  { %s1925_s0 = inlined_call_operand.hbm [shape: f32[2,8,32], index: 0, kind: input, shape index: {}]   ;;  %s1926_s1 = inlined_call_operand.hbm [shape: f32[32,32], index: 1, kind: input, shape index: {}]   ;;  %s1927_s2 = inlined_call_operand.hbm [shape: f32[32,32], index: 2, kind: input, shape index: {}]   ;;  %s1928_s3 = inlined_call_operand.hbm [shape: f32[32,32], index: 3, kind: input, shape index: {}]   ;;  %s1929_s4 = inlined_call_operand.hbm [shape: f32[32,32], index: 4, kind: input, shape index: {}]   ;;  %s1930_s5 = inlined_call_operand.vmem [shape: f32[1,32], index: 5, kind: input, shape index: {}]   ;;  %s1931_s6 = inlined_call_operand.hbm [shape: f32[2,8,32], index: 6, kind: output, shape index: {}]  }
   0x1   :  { %1936 = sst [smem:[#allocation16_spill]] %s1926_s1 }
   0x2   :  { %11 = vsyncpa [#allocation3], 0 }
   0x3   :  { %13 = vsyncpa [#allocation3 + $0x1], 0 }
   0x4   :  { %14 = vsyncpa [#allocation6], 0 }
   0x5   :  { %15 = vsyncpa [#allocation9], 0 }
   0x6   :  { %16 = vsyncpa [#allocation4], 0 }
   0x7   :  { %18 = vsyncpa [#allocation4 + $0x1], 0  ;;  %s1643_s21 = smov 0   ;;  %s1645_s22 = smov 0  }
   0x8   :  { %s1647_s23 = smov 0   ;;  %s1649_s24 = smov 0  }
   0x9 LB: > { %s1597_s25 = smov [#allocation5]   ;;  %s1664_s27 = sadd.s32 4294967295, %s1595_s24   ;;  %s1595_s24 = sphi %s1649_s24, %s1957_s24   ;;  %s1591_s23 = sphi %s1647_s23, %s1956_s23   ;;  %s1587_s22 = sphi %s1645_s22, %s1955_s22   ;;  %s1583_s21 = sphi %s1643_s21, %s1954_s21  }
   0xa   : > { %s198_s26 = sshll.u32 %s1597_s25, 4  ;;  %p1164_p0 = scmp.ge.s32.totalorder %s1595_s24, 1  ;;  %s199_s26 = int_to_ptr.vmem [resolvable:$true] %s198_s26 }
   0xb   : > { %p1932_p1 = scmp.eq.s32.totalorder %s1664_s27, 0  ;;  %p186_p2 = scmp.lt.s32.totalorder %s1595_s24, 3 }
   0xc   : > { %s1598_s29 = smov [#allocation8]   ;;  %s1599_s8 = smov [#allocation7]  }
   0xd   : > { %p1669_p3 = pnand %p1164_p0, %p186_p2  ;;  %s224_s30 = sshll.u32 %s1598_s29, 4  ;;  %s1682_s30 = int_to_ptr.vmem [resolvable:$true] %s224_s30 }
   0xe   : > { %s211_s9 = sshll.u32 %s1599_s8, 4  ;;  %s1402_s10 = scalar_lea.vmem %s199_s26, 512  ;;  %s1684_s9 = int_to_ptr.vmem [resolvable:$true] %s211_s9 }
   0xf   : > { %s1937_s28 = scalar_select %p1669_p3, 1, 0 }
  0x10   : > { %p1311_p5 = pneg %p1669_p3  ;;  %p1403_p8 = scmp.ne.s32.totalorder %s199_s26, %s1402_s10 }
  0x11   : > { %p1410_p11 = scmp.lt.s32.totalorder %s199_s26, %s199_s26  ;;  %p1411_p12 = scmp.lt.s32.totalorder %s1402_s10, %s1402_s10 }
  0x12   : > { %p1678_p6 = pnand %p1311_p5, %p1932_p1 }
  0x13   : > { %p1412_p13 = por %p1411_p12, %p1410_p11 }
  0x14   : > { %p1393_p7 = pneg %p1678_p6 }
  0x16   : > { %p1405_p9 = pnand %p1403_p8, %p1393_p7 }
  0x18   : > { %p1406_p10 = pneg %p1405_p9 }
  0x1a   : > { %p1413_p0 = pnand %p1412_p13, %p1406_p10 }
  0x1c   : > { %1416 = shalt.err (!%p1413_p0)
}
  0x1d   : > { %s1600_s11 = smov 128   ;;  %s1601_s12 = smov 8  }
  0x1e   : > { %s1939_s1 = sld [smem:[#allocation16_spill]]  ;;  %s1428_s15 = scalar_lea.vmem %s1682_s30, 512 }
  0x1f   : > { %p1429_p2 = scmp.ne.s32.totalorder %s1682_s30, %s1428_s15  ;;  %p1436_p9 = scmp.lt.s32.totalorder %s1682_s30, %s1682_s30 }
  0x20   : > { %p1437_p10 = scmp.lt.s32.totalorder %s1428_s15, %s1428_s15 }
  0x21   : > { %p1431_p5 = pnand %p1429_p2, %p1393_p7 }
  0x22   : > { %p1438_p11 = por %p1437_p10, %p1436_p9 }
  0x23   : > { %p1432_p8 = pneg %p1431_p5 }
  0x24   : > { %1314 = dma.hbm_to_vmem [thread:$0]  (!%p1678_p6), %s1939_s1, 512, %s199_s26, [#allocation6], %s1600_s11, %s1600_s11, %s1601_s12  }
  0x25   : > { %p1439_p12 = pnand %p1438_p11, %p1432_p8 }
  0x27   : > { %1442 = shalt.err (!%p1439_p12)
}
  0x28   : > { %1320 = dma.hbm_to_vmem [thread:$0]  (!%p1678_p6), %s1928_s3, 512, %s1682_s30, [#allocation9], %s1600_s11, %s1600_s11, %s1601_s12  }
  0x29   : > { %s1454_s18 = scalar_lea.vmem %s1684_s9, 512  ;;  %p1462_p5 = scmp.lt.s32.totalorder %s1684_s9, %s1684_s9 }
  0x2a   : > { %p1455_p13 = scmp.ne.s32.totalorder %s1684_s9, %s1454_s18  ;;  %p1463_p8 = scmp.lt.s32.totalorder %s1454_s18, %s1454_s18 }
  0x2c   : > { %p1457_p0 = pnand %p1455_p13, %p1393_p7  ;;  %p1464_p9 = por %p1463_p8, %p1462_p5 }
  0x2e   : > { %p1458_p2 = pneg %p1457_p0 }
  0x30   : > { %p1465_p10 = pnand %p1464_p9, %p1458_p2 }
  0x32   : > { %1468 = shalt.err (!%p1465_p10)
}
  0x33   : > { %1317 = dma.hbm_to_vmem [thread:$0]  (!%p1678_p6), %s1927_s2, 512, %s1684_s9, [#allocation6], %s1600_s11, %s1600_s11, %s1601_s12  }
  0x34   : > { %s1602_s25 = smov [#allocation10]  }
  0x35   : > { %s237_s26 = sshll.u32 %s1602_s25, 4  ;;  %s238_s26 = int_to_ptr.vmem [resolvable:$true] %s237_s26 }
  0x36   : > { %s1480_s29 = scalar_lea.vmem %s238_s26, 512  ;;  %p1488_p0 = scmp.lt.s32.totalorder %s238_s26, %s238_s26 }
  0x37   : > { %p1481_p11 = scmp.ne.s32.totalorder %s238_s26, %s1480_s29  ;;  %p1489_p2 = scmp.lt.s32.totalorder %s1480_s29, %s1480_s29 }
  0x39   : > { %p1483_p12 = pnand %p1481_p11, %p1393_p7  ;;  %p1490_p5 = por %p1489_p2, %p1488_p0 }
  0x3b   : > { %p1484_p13 = pneg %p1483_p12 }
  0x3d   : > { %p1491_p8 = pnand %p1490_p5, %p1484_p13 }
  0x3f   : > { %1494 = shalt.err (!%p1491_p8)
}
  0x40   : > { %1323 = dma.hbm_to_vmem [thread:$0]  (!%p1678_p6), %s1929_s4, 512, %s238_s26, [#allocation9], %s1600_s11, %s1600_s11, %s1601_s12  }
  0x41   : > { %s1163_s7 = sadd.s32 4294967294, %s1595_s24   ;;  %s1744_s9 = sadd.s32 1, %s1595_s24  }
  0x42   : > { %s28_s10 = ssub.s32 %s1595_s24, %s1744_s9  ;;  %s31_s13 = sadd.s32 1, %s1591_s23 }
  0x43   : > { %p29_p7 = scmp.eq.s32.totalorder %s28_s10, 0  ;;  %p38_p9 = scmp.ne.s32.totalorder %s1591_s23, %s1587_s22 }
  0x44   : > { %p39_p10 = scmp.eq.s32.totalorder %s1595_s24, 0  ;;  %p44_p11 = scmp.ne.s32.totalorder %s1587_s22, %s1583_s21 }
  0x45   : > { %s1755_s14 = scalar_select %p29_p7, %s1591_s23, %s31_s13  }
  0x46   : > { %p1757_p12 = por %p39_p10, %p38_p9  ;;  %p1763_p6 = por %p1932_p1, %p44_p11 }
  0x47   : > { %p173_p13 = scmp.eq.s32.totalorder %s1664_s27, 1  ;;  %p179_p0 = scmp.eq.s32.totalorder %s1163_s7, 1 }
  0x48   : > { %s1941_s11 = scalar_select %p1763_p6, 1, 0 }
  0x49   : > { %p1336_p2 = scmp.lt.s32.totalorder %s1595_s24, 2  ;;  %s254_s12 = sand.u32 1, %s1591_s23  }
  0x4a   : > { %p1770_p5 = por %p173_p13, %p38_p9  ;;  %p1774_p8 = por %p179_p0, %p44_p11 }
  0x4b   : > { %s1170_s18 = sshll.u32 %s254_s12, 3  ;;  %s1171_s19 = sshll.u32 %s1595_s24, 7 }
  0x4c   : > { %s1942_s16 = scalar_select %p1770_p5, 1, 0 }
  0x4d   : > { %s1943_s17 = scalar_select %p1774_p8, 1, 0 }
  0x4e   : > { %s1782_s26 = scalar_lea.hbm %s1925_s0, %s1171_s19  ;;  %s258_s29 = scalar_lea.vmem [#allocation2], %s1170_s18 }
  0x4f   : > { %s265_s30 = sshll.u32 %s258_s29, 4  ;;  %p1786_p7 = pnand %p1336_p2, %p1757_p12  ;;  %s266_s30 = int_to_ptr.vmem [resolvable:$true] %s265_s30 }
  0x50   : > { %s255_s7 = scalar_lea.sflag [#allocation3], %s254_s12  ;;  %s1495_s10 = scalar_lea.hbm %s1782_s26, 128 }
  0x51   : > { %p1496_p9 = scmp.ne.s32.totalorder %s1782_s26, %s1495_s10  ;;  %p1497_p10 = pneg %p1786_p7 }
  0x52   : > { %s1500_s20 = scalar_lea.hbm %s1925_s0, 256  ;;  %p1501_p0 = scmp.lt.s32.totalorder %s1782_s26, %s1925_s0 }
  0x53   : > { %p1498_p11 = pnand %p1497_p10, %p1496_p9  ;;  %p1502_p12 = scmp.lt.s32.totalorder %s1500_s20, %s1495_s10 }
  0x55   : > { %p1499_p13 = pneg %p1498_p11  ;;  %p1503_p2 = por %p1502_p12, %p1501_p0 }
  0x57   : > { %p1504_p4 = pnand %p1503_p2, %p1499_p13 }
  0x59   : > { %1507 = shalt.err (!%p1504_p4)
}
  0x5a   : > { %s1508_s15 = scalar_lea.vmem %s266_s30, 128  ;;  %s1603_s12 = smov [#allocation2]  }
  0x5b   : > { %p1509_p1 = scmp.ne.s32.totalorder %s266_s30, %s1508_s15  ;;  %s1513_s29 = sshll.u32 %s1603_s12, 4  ;;  %s1514_s29 = int_to_ptr.vmem [resolvable:$false] %s1513_s29 }
  0x5c   : > { %s1515_s1 = scalar_lea.vmem %s1514_s29, 256  ;;  %p1516_p9 = scmp.lt.s32.totalorder %s266_s30, %s1514_s29 }
  0x5d   : > { %p1511_p8 = pnand %p1509_p1, %p1497_p10  ;;  %p1517_p11 = scmp.lt.s32.totalorder %s1515_s1, %s1508_s15 }
  0x5f   : > { %p1512_p5 = pneg %p1511_p8  ;;  %p1518_p6 = por %p1517_p11, %p1516_p9 }
  0x61   : > { %p1519_p3 = pnand %p1518_p6, %p1512_p5 }
  0x63   : > { %1522 = shalt.err (!%p1519_p3)
}
  0x64   : > { %1327 = dma.hbm_to_vmem [thread:$0]  (!%p1786_p7), %s1782_s26, 128, %s266_s30, %s255_s7  }
  0x65   : > { %p1945_p13 = scmp.ne.s32.totalorder %s1937_s28, 0 }
  0x66   : > { %s1807_s10 = sand.u32 (!%p1945_p13), 1, %s1587_s22   ;;  %p1946_p1 = scmp.ne.s32.totalorder (!%p1945_p13), %s1941_s11, 0 }
  0x67   : > { %274 = sbr.rel (%p1945_p13) target bundleno = 1347 (0x543), region = 44  ;;  %s1173_s13 = sshll.u32 (!%p1945_p13), %s1807_s10, 3 }
  0x68   : > { %s277_s19 = scalar_lea.sflag (!%p1945_p13), [#allocation3], %s1807_s10  ;;  %s1813_s1 = scalar_lea.vmem (!%p1945_p13), [#allocation2], %s1173_s13 }
  0x6c   : > { %1566 = dma.done.wait (%p1946_p1), %s277_s19, 128  }
  0x6d   : > { %1568 = vsyncadd (%p1946_p1), %s277_s19, 4294967168  ;;  %p1947_p3 = scmp.eq.s32.totalorder %s1664_s27, 0 }
  0x6f   : > { %1570 = dma.done.wait (%p1947_p3), [#allocation6], 1024   ;;  %p1948_p4 = pmov %p1947_p3 }
  0x70   : > { %p1949_p6 = pmov %p1947_p3 }
  0x71   : > { %1572 = vsyncadd (%p1948_p4), [#allocation6], 4294966272 }
  0x72   : > { %1574 = dma.done.wait (%p1949_p6), [#allocation9], 1024   ;;  %p1950_p5 = pmov %p1947_p3 }
  0x73   : > { %v1604_v0 = vmov 0.0   ;;  %vm1605_vm0 = vmmov 0   ;;  %v407_v1 = vld [vmem:[#allocation7 + $0x18] sm:$0xff]  ;;  %v406_v3 = vld [vmem:[#allocation7 + $0x10] sm:$0xff]  ;;  %v405_v5 = vld [vmem:[#allocation7 + $0x8] sm:$0xff]  ;;  %vm330_vm1 = vcmask 261120  }
  0x74   : > { %1576 = vsyncadd (%p1950_p5), [#allocation9], 4294966272  ;;  %1235 = vmatprep.subr.mxu1 %v1604_v0  ;;  %1224 = vmatprep.subr.mxu0 %v1604_v0  ;;  %v329_v2 = vld [vmem:[#allocation5 + $0x18] sm:$0xff]  ;;  %v328_v4 = vld [vmem:[#allocation5 + $0x10] sm:$0xff]  ;;  %vm552_vm2 = vcmask 130048   ;;  %s1606_s28 = smov 112  }
  0x75   : > { %1243 = vmatprep.mubr.msk.f32.mxu1 %vm1605_vm0, %v1604_v0  ;;  %1232 = vmatprep.mubr.msk.f32.mxu0 %vm1605_vm0, %v1604_v0  ;;  %v327_v6 = vld [vmem:[#allocation5 + $0x8] sm:$0xff]  ;;  %v404_v7 = vld [vmem:[#allocation7] sm:$0xff]  ;;  %v325_v9 = vld [vmem:[%s1813_s1] sm:$0xff]  ;;  %vm630_vm3 = vcmask 64512   ;;  %s1192_s30 = sshll.u32 %s1664_s27, 7  ;;  %s324_s8 = scalar_lea.vmem [#allocation11], %s1173_s13 }
  0x76   : > { %1236 = vmatpush3.msra.mxu1 %v407_v1  ;;  %1225 = vmatpush3.msra.mxu0 %v329_v2  ;;  %v326_v8 = vld [vmem:[#allocation5] sm:$0xff]  ;;  %v481_v10 = vld [vmem:[#allocation8 + $0x18] sm:$0xff]  ;;  %v480_v11 = vld [vmem:[#allocation8 + $0x10] sm:$0xff]  ;;  %s1055_s7 = sshll.u32 %s324_s8, 4  ;;  %s1053_s25 = scalar_lea.hbm %s1931_s6, %s1192_s30  ;;  %s1056_s7 = int_to_ptr.vmem [resolvable:$true] %s1055_s7 }
  0x77   : > { %1237 = vmatprep.subr.mxu1 %v1604_v0  ;;  %1226 = vmatprep.subr.mxu0 %v1604_v0  ;;  %v479_v12 = vld [vmem:[#allocation8 + $0x8] sm:$0xff]  ;;  %v478_v13 = vld [vmem:[#allocation8] sm:$0xff]  ;;  %v885_v43 = vld [vmem:[#allocation10 + $0x18] sm:$0xff]  ;;  %s1042_s15 = scalar_lea.sflag [#allocation4], %s1807_s10  ;;  %s1523_s12 = scalar_lea.vmem %s1056_s7, 128 }
  0x78   : > { %1238 = vmatpush3.msra.mxu1 %v406_v3  ;;  %1227 = vmatpush3.msra.mxu0 %v328_v4  ;;  %v884_v44 = vld [vmem:[#allocation10 + $0x10] sm:$0xff]  ;;  %v716_v49 = vld [vmem:[#allocation10 + $0x8] sm:$0xff]  ;;  %v715_v50 = vld [vmem:[#allocation10] sm:$0xff]  ;;  %p1524_p8 = scmp.ne.s32.totalorder %s1056_s7, %s1523_s12  ;;  %p1951_p7 = scmp.ne.s32.totalorder %s1942_s16, 0 }
  0x79   : > { %1239 = vmatprep.subr.mxu1 %v1604_v0  ;;  %1228 = vmatprep.subr.mxu0 %v1604_v0  ;;  %v1190_v58 = vld [vmem:[%s1930_s5] ss:$0 sm:$0xff]  ;;  %s1607_s27 = smov [#allocation11]  }
  0x7a   : > { %1240 = vmatpush3.msra.mxu1 %v405_v5  ;;  %1229 = vmatpush3.msra.mxu0 %v327_v6  ;;  %p1525_p10 = pnand %p1524_p8, %p1951_p7  ;;  %s1527_s29 = sshll.u32 %s1607_s27, 4  ;;  %s1528_s29 = int_to_ptr.vmem [resolvable:$false] %s1527_s29 }
  0x7b   : > { %1241 = vmatprep.subr.mxu1 %v1604_v0  ;;  %1230 = vmatprep.subr.mxu0 %v1604_v0  ;;  %s1529_s13 = scalar_lea.vmem %s1528_s29, 256  ;;  %p1530_p12 = scmp.lt.s32.totalorder %s1056_s7, %s1528_s29 }
  0x7c   : > { %1242 = vmatpush3.msra.mxu1 %v404_v7  ;;  %1231 = vmatpush3.msra.mxu0 %v326_v8  ;;  %p1526_p0 = pneg %p1525_p10  ;;  %p1531_p2 = scmp.lt.s32.totalorder %s1529_s13, %s1523_s12 }
  0x7d   : > { %1244 = vmatmul.mubr.msk.f32.vlgmr.msra.gmra.mxu1 %vm330_vm1, %v325_v9  ;;  %1233 = vmatmul.mubr.msk.f32.vlgmr.msra.gmra.mxu0 %vm330_vm1, %v325_v9 }
  0x7e   : > { %1257 = vmatprep.subr.mxu1 %v1604_v0  ;;  %1259 = vmatprep.mubr.msk.f32.mxu1 %vm1605_vm0, %v1604_v0  ;;  %p1532_p9 = por %p1531_p2, %p1530_p12 }
  0x7f   : > { %1246 = vmatprep.subr.mxu0 %v1604_v0  ;;  %1254 = vmatprep.mubr.msk.f32.mxu0 %vm1605_vm0, %v1604_v0 }
  0x80   : > { %1247 = vmatpush3.msra.mxu0 %v481_v10  ;;  %p1533_p11 = pnand %p1532_p9, %p1526_p0 }
  0x81   : > { %1248 = vmatprep.subr.mxu0 %v1604_v0 }
  0x82   : > { %1249 = vmatpush3.msra.mxu0 %v480_v11 }
  0x83   : > { %1250 = vmatprep.subr.mxu0 %v1604_v0 }
  0x84   : > { %1251 = vmatpush3.msra.mxu0 %v479_v12 }
  0x85   : > { %1252 = vmatprep.subr.mxu0 %v1604_v0 }
  0x86   : > { %1253 = vmatpush3.msra.mxu0 %v478_v13 }
  0x87   : > { %1255 = vmatmul.mubr.msk.f32.vlgmr.msra.gmra.mxu0 %vm330_vm1, %v325_v9  ;;  %1267 = vmatprep.subr.mxu0 %v1604_v0 }
  0x88   : > { %1269 = vmatprep.mubr.msk.f32.mxu0 %vm1605_vm0, %v1604_v0 }
 0x13d   : > { %v474_v14 = vpop.f32.mrf.mxu1  ;;  %v400_v15 = vpop.f32.mrf.mxu0 }
 0x13e   : > { %719 = vrot.lane.b32.xlu0 %v474_v14, %s1606_s28  ;;  %1258 = vmatpush3.xpose.msk.msra.mxu1 %vm552_vm2, %v474_v14 }
 0x13f   : > { %v1245_v16 = vpop.f32.mrf.mxu1  ;;  %v1234_v17 = vpop.f32.mrf.mxu0  ;;  %1262 = vmatprep.subr.mxu1 %v1604_v0 }
 0x141   : > { %1260 = vmatmul.mubr.msk.f32.vlgmr.msra.gmra.mxu1 %vm552_vm2, %v400_v15 }
 0x142   : > { %717 = vrot.lane.b32.xlu0 %v400_v15, %s1606_s28  ;;  %1264 = vmatprep.mubr.msk.f32.mxu1 %vm1605_vm0, %v1604_v0 }
 0x147   : > { %v548_v18 = vpop.f32.mrf.mxu0 }
 0x148   : > { %1263 = vmatpush3.msra.mxu1 %v548_v18 }
 0x149   : > { %v1256_v19 = vpop.f32.mrf.mxu0  ;;  %1272 = vmatprep.subr.mxu1 %v1604_v0 }
 0x1b0   : > { %v720_v20 = vpop.permute.xlu0 %719 }
 0x1b1   : > { %1268 = vmatpush3.xpose.msk.msra.mxu0 %vm552_vm2, %v720_v20 }
 0x1b2   : > { %1277 = vmatprep.subr.mxu0 %v1604_v0 }
 0x1b4   : > { %v718_v21 = vpop.permute.xlu0 %717 }
 0x1b5   : > { %1270 = vmatmul.mubr.msk.f32.vlgmr.msra.gmra.mxu0 %vm552_vm2, %v718_v21 }
 0x1b6   : > { %1281 = vmatprep.mubr.msk.f32.mxu0 %vm1605_vm0, %v1604_v0  ;;  %1278 = vmatpush3.msra.mxu0 %v885_v43 }
 0x1b7   : > { %1279 = vmatprep.subr.mxu0 %v1604_v0 }
 0x1b8   : > { %1280 = vmatpush3.msra.mxu0 %v884_v44 }
 0x201   : > { %v625_v22 = vpop.f32.mrf.mxu1 }
 0x202   : > { %v629_v23 = vmul.f32 0.25, %v625_v22 }
 0x203   : > { %v1261_v24 = vpop.f32.mrf.mxu1 }
 0x204   : > { %v631_v25 = vsel %vm630_vm3, %v629_v23, -inf }
 0x205   : > { %632 = vmax.xlane.f32.xlu1 %v631_v25 }
 0x275   : > { %v791_v26 = vpop.f32.mrf.mxu0 }
 0x276   : > { %v795_v27 = vmul.f32 0.25, %v791_v26 }
 0x277   : > { %v1271_v28 = vpop.f32.mrf.mxu0 }
 0x278   : > { %v796_v29 = vsel %vm630_vm3, %v795_v27, -inf }
 0x279   : > { %797 = vmax.xlane.f32.xlu1 %v796_v29 }
 0x28e   : > { %v633_v30 = vpop.xlane.xlu1 %632 }
 0x28f   : > { %v634_v31 = vsub.f32 %v629_v23, %v633_v30 }
 0x291   : > { %v635_v32 = vmul.f32 1.442695, %v634_v31 }
 0x293   : > { %1383 = vpow2.f32 %v635_v32 }
 0x2a0   : > { %v1384_v33 = vpop.eup %1383 }
 0x2a1   : > { %v637_v34 = vsel %vm630_vm3, %v1384_v33, 0.0 }
 0x2a2   : > { %638 = vadd.xlane.f32.xlu0 %v637_v34 }
 0x302   : > { %v798_v35 = vpop.xlane.xlu1 %797 }
 0x303   : > { %v799_v36 = vsub.f32 %v795_v27, %v798_v35 }
 0x305   : > { %v800_v37 = vmul.f32 1.442695, %v799_v36 }
 0x307   : > { %1385 = vpow2.f32 %v800_v37 }
 0x314   : > { %v1386_v38 = vpop.eup %1385 }
 0x315   : > { %v802_v39 = vsel %vm630_vm3, %v1386_v38, 0.0 }
 0x316   : > { %803 = vadd.xlane.f32.xlu1 %v802_v39 }
 0x327   : > { %808 = vrot.lane.b32.xlu1 %v548_v18, %s1606_s28 }
 0x32b   : > { %v639_v40 = vpop.xlane.xlu0 %638 }
 0x32c   : > { %1387 = vrcp.f32 %v639_v40 }
 0x339   : > { %v1388_v41 = vpop.eup %1387 }
 0x33a   : > { %v641_v42 = vmul.f32 %v1388_v41, %v1384_v33 }
 0x33c   : > { %1265 = vmatmul.mubr.msk.f32.vlgmr.msra.gmra.mxu1 %vm630_vm3, %v641_v42 }
 0x33d   : > { %1274 = vmatprep.mubr.msk.f32.mxu1 %vm1605_vm0, %v1604_v0 }
 0x39f   : > { %v804_v45 = vpop.xlane.xlu1 %803 }
 0x3a0   : > { %1389 = vrcp.f32 %v804_v45 }
 0x3a3   : > { %v809_v46 = vpop.permute.xlu1 %808 }
 0x3a4   : > { %1273 = vmatpush3.msra.mxu1 %v809_v46 }
 0x3a5   : > { %1284 = vmatprep.subr.mxu1 %v1604_v0 }
 0x3ad   : > { %v1390_v47 = vpop.eup %1389 }
 0x3ae   : > { %v806_v48 = vmul.f32 %v1390_v47, %v1386_v38 }
 0x3b0   : > { %1275 = vmatmul.mubr.msk.f32.vlgmr.msra.gmra.mxu1 %vm630_vm3, %v806_v48 }
 0x3b1   : > { %1285 = vmatpush3.msra.mxu1 %v716_v49  ;;  %1288 = vmatprep.mubr.msk.f32.mxu1 %vm1605_vm0, %v1604_v0 }
 0x3b2   : > { %1286 = vmatprep.subr.mxu1 %v1604_v0 }
 0x3b3   : > { %1287 = vmatpush3.msra.mxu1 %v715_v50 }
 0x3fc   : > { %v711_v51 = vpop.f32.mrf.mxu1 }
 0x3fd   : > { %1289 = vmatmul.mubr.msk.f32.vlgmr.msra.gmra.mxu1 %vm552_vm2, %v711_v51 }
 0x3fe   : > { %v1266_v52 = vpop.f32.mrf.mxu1 }
 0x470   : > { %v880_v53 = vpop.f32.mrf.mxu1 }
 0x471   : > { %1282 = vmatmul.mubr.msk.f32.vlgmr.msra.gmra.mxu0 %vm552_vm2, %v880_v53 }
 0x472   : > { %v1276_v54 = vpop.f32.mrf.mxu1 }
 0x4bd   : > { %v1028_v55 = vpop.f32.mrf.mxu1 }
 0x4bf   : > { %v1290_v56 = vpop.f32.mrf.mxu1 }
 0x531   : > { %v955_v57 = vpop.f32.mrf.mxu0 }
 0x532   : > { %v1029_v59 = vadd.f32 %v1028_v55, %v955_v57 }
 0x533   : > { %v1283_v60 = vpop.f32.mrf.mxu0 }
 0x534   : > { %v1039_v61 = vadd.f32 %v1190_v58, %v1029_v59 }
 0x536   : > { %1040 = vst.msk [vmem:[%s324_s8] sm:$0xff] %vm330_vm1, %v1039_v61 }
 0x537   : > { %1536 = shalt.err (!%p1533_p11)
}
 0x538   : > { %s1537_s19 = scalar_lea.hbm %s1053_s25, 128  ;;  %s1541_s28 = scalar_lea.hbm %s1931_s6, 256 }
 0x539   : > { %p1538_p13 = scmp.ne.s32.totalorder %s1053_s25, %s1537_s19  ;;  %p1542_p4 = scmp.lt.s32.totalorder %s1053_s25, %s1931_s6 }
 0x53a   : > { %p1543_p6 = scmp.lt.s32.totalorder %s1541_s28, %s1537_s19 }
 0x53b   : > { %p1539_p1 = pnand %p1538_p13, %p1951_p7 }
 0x53c   : > { %p1544_p5 = por %p1543_p6, %p1542_p4 }
 0x53d   : > { %p1540_p3 = pneg %p1539_p1 }
 0x53f   : > { %p1545_p8 = pnand %p1544_p5, %p1540_p3 }
 0x541   : > { %1548 = shalt.err (!%p1545_p8)
}
 0x542   : > { %1309 = dma.vmem_to_hbm [thread:$0]  (%p1951_p7), %s1056_s7, 128, %s1053_s25, %s1042_s15  }
 0x543 PF: > { %s1067_s30 = sand.u32 1, %s1583_s21   ;;  %p1952_p10 = scmp.ne.s32.totalorder %s1943_s17, 0 }
 0x544   : > { %p1953_p0 = scmp.ge.s32.totalorder %s1595_s24, 2  ;;  %s1068_s8 = scalar_lea.sflag [#allocation4], %s1067_s30 }
 0x546   : > { %p1329_p12 = pnand %p1953_p0, %p1952_p10 }
 0x548   : > { %p1330_p2 = pneg %p1329_p12 }
 0x54a   : > { %1578 = dma.done.wait (%p1330_p2), %s1068_s8, 128  }
 0x54b   : > { %1580 = vsyncadd (%p1330_p2), %s1068_s8, 4294967168  ;;  %p21_p9 = scmp.ge.s32.totalorder %s1744_s9, 4   ;;  %s1954_s21 = smov %s1587_s22 }
 0x54c   : > { %s1955_s22 = smov %s1591_s23  ;;  %s1956_s23 = smov %s1755_s14 }
 0x54d   : > { %s1957_s24 = smov %s1744_s9  ;;  %23 = sbr.rel (!%p21_p9) target bundleno = 9 (0x9), region = 105 }
 0x552   :  { %1073 = vsyncpa [#allocation3], 1 }
 0x553   :  { %1075 = vsyncpa [#allocation3 + $0x1], 1 }
 0x554   :  { %1076 = vsyncpa [#allocation6], 1 }
 0x555   :  { %1077 = vsyncpa [#allocation9], 1 }
 0x556   :  { %1078 = vsyncpa [#allocation4], 1 }
 0x557   :  { %1080 = vsyncpa [#allocation4 + $0x1], 1 }

</bundles_post_ra>
